<compile_context>
chip_gen: v5e
topology: v5e:2x2
jax: 0.10.0
libtpu: 0.0.40
codegen_flags: <defaults>
</compile_context>

<pallas_src>
import jax
import jax.numpy as jnp
from jax.experimental import pallas as pl
from jax.experimental.pallas import tpu as pltpu


def _scse_kernel(x_ref, w1_ref, b1_ref, w2_ref, b2_ref, wsse_ref, bsse_ref, o_ref):
    # x_ref block: (NB, C, HW) -- NB batch elements per grid step, full C and HW.
    x = x_ref[...].astype(jnp.float32)                        # (NB, C, HW)

    # ---- cSE branch: global average pool over spatial (lane reduce) + 2 tiny matmuls ----
    avg = jnp.mean(x, axis=-1)                                # (NB, C)
    h = jnp.dot(avg, w1_ref[...], preferred_element_type=jnp.float32) + b1_ref[...]
    h = jnp.maximum(h, 0.0)                                   # ReLU, (NB, Cr)
    c_logit = jnp.dot(h, w2_ref[...], preferred_element_type=jnp.float32) + b2_ref[...]
    c_gate = jax.nn.sigmoid(c_logit)[:, :, None]              # (NB, C, 1) -> broadcast over HW

    # ---- sSE branch: 1x1 conv to 1 channel == broadcast-mul + channel reduce ----
    wsse = wsse_ref[...]                                      # (1, C)
    s_logit = jnp.sum(x * wsse[:, :, None], axis=1) + bsse_ref[0, 0]   # (NB, HW), lane-dense
    s_gate = jax.nn.sigmoid(s_logit)[:, None, :]              # (NB, 1, HW) -> broadcast over C

    # Factored gating: one add + one mul per element instead of 2 muls + 1 add.
    o_ref[...] = (x * (c_gate + s_gate)).astype(o_ref.dtype)


def _choose_block_batch(n, per_batch_bytes, budget_bytes=2 << 20):
    """Largest divisor of n whose block fits the VMEM budget; prefer >=2 grid steps (v7x megacore)."""
    max_nb = max(1, budget_bytes // max(1, per_batch_bytes))
    divisors = [d for d in range(1, n + 1) if n % d == 0 and d <= max_nb]
    if not divisors:
        return 1
    preferred = [d for d in divisors if n // d >= 2]
    return max(preferred) if preferred else max(divisors)


def scse_attention(x_nchw, params):
    """x_nchw: (N, C, H, W).  Returns (N, C, H, W), same dtype."""
    w1, b1, w2, b2, wsse, bsse = params
    N, C, H, W = x_nchw.shape
    HW = H * W
    Cr = w1.shape[1]

    # NCHW is already (N, C, HW)-contiguous: reshape only, no transpose / extra HBM traffic.
    x = x_nchw.reshape(N, C, HW)
    wsse_row = wsse.reshape(1, C)   # (C,1) column -> (1,C) row, same data order

    nb = _choose_block_batch(N, C * HW * x.dtype.itemsize)
    grid = (N // nb,)

    # TODO(synk): for realistic sizes (e.g. C=256, HW=128*128) add an HW-tiled two-pass
    # reduction (mean accumulate, then gate) so a block fits v7x/v5e VMEM limits.
    out = pl.pallas_call(
        _scse_kernel,
        out_shape=jax.ShapeDtypeStruct((N, C, HW), x.dtype),
        grid_spec=pltpu.PrefetchScalarGridSpec(
            num_scalar_prefetch=0,
            grid=grid,
            in_specs=[
                pl.BlockSpec((nb, C, HW), lambda b: (b, 0, 0)),   # x (batch-fused block)
                pl.BlockSpec((C, Cr), lambda b: (0, 0)),          # w1
                pl.BlockSpec((1, Cr), lambda b: (0, 0)),          # b1
                pl.BlockSpec((Cr, C), lambda b: (0, 0)),          # w2
                pl.BlockSpec((1, C), lambda b: (0, 0)),           # b2
                pl.BlockSpec((1, C), lambda b: (0, 0)),           # w_sSE (row)
                pl.BlockSpec((1, 1), lambda b: (0, 0)),           # b_sSE
            ],
            out_specs=pl.BlockSpec((nb, C, HW), lambda b: (b, 0, 0)),
        ),
        compiler_params=pltpu.CompilerParams(
            dimension_semantics=("parallel",)),
    )(x, w1, b1, w2, b2, wsse_row, bsse)

    return out.reshape(N, C, H, W)


def _reference(x_nchw, params):
    """Pure-JAX reference of SCSEModule.forward for verification."""
    w1, b1, w2, b2, wsse, bsse = params
    xf = x_nchw.astype(jnp.float32)
    avg = jnp.mean(xf, axis=(2, 3))                                  # (N, C)
    h = jnp.maximum(avg @ w1 + b1, 0.0)                              # (N, Cr)
    c_gate = jax.nn.sigmoid(h @ w2 + b2)                             # (N, C)
    c_gate = c_gate[:, :, None, None]
    s_logit = jnp.einsum('nchw,co->nohw', xf, wsse) + bsse[0, 0]     # (N, 1, H, W)
    s_gate = jax.nn.sigmoid(s_logit)
    return (xf * c_gate + xf * s_gate).astype(x_nchw.dtype)


if __name__ == "__main__":
    # Small shapes consistent with SCSEModule(in_channels=32, reduction=16)
    N, C, H, W = 2, 32, 16, 16
    reduction = 16
    Cr = C // reduction  # 2

    key = jax.random.PRNGKey(0)
    kx, k1, k2, k3, k4, k5, k6 = jax.random.split(key, 7)

    x = jax.random.normal(kx, (N, C, H, W), dtype=jnp.float32)

    # Deterministic parameter init (shapes match the nn.Conv2d 1x1 layers).
    w1 = jax.random.normal(k1, (C, Cr), dtype=jnp.float32) * 0.1     # cSE conv1: C -> C//r
    b1 = jax.random.normal(k2, (1, Cr), dtype=jnp.float32) * 0.1
    w2 = jax.random.normal(k3, (Cr, C), dtype=jnp.float32) * 0.1     # cSE conv2: C//r -> C
    b2 = jax.random.normal(k4, (1, C), dtype=jnp.float32) * 0.1
    wsse = jax.random.normal(k5, (C, 1), dtype=jnp.float32) * 0.1    # sSE conv: C -> 1
    bsse = jax.random.normal(k6, (1, 1), dtype=jnp.float32) * 0.1

    params = (w1, b1, w2, b2, wsse, bsse)

    out = scse_attention(x, params)
    out = jax.block_until_ready(out)

    ref = jax.block_until_ready(_reference(x, params))
    assert out.shape == (N, C, H, W)
    assert jnp.allclose(out, ref, atol=1e-5, rtol=1e-5)

    print("KERNEL_OK")
</pallas_src>

<mosaic_0001>
module attributes {stable_mosaic.version = 11 : i64} {
  func.func @_scse_kernel(%arg0: i32, %arg1: memref<1x32x256xf32, #tpu.memory_space<vmem>>, %arg2: memref<32x2xf32, #tpu.memory_space<vmem>>, %arg3: memref<1x2xf32, #tpu.memory_space<vmem>>, %arg4: memref<2x32xf32, #tpu.memory_space<vmem>>, %arg5: memref<1x32xf32, #tpu.memory_space<vmem>>, %arg6: memref<1x32xf32, #tpu.memory_space<vmem>>, %arg7: memref<1x1xf32, #tpu.memory_space<vmem>>, %arg8: memref<1x32x256xf32, #tpu.memory_space<vmem>>) attributes {dimension_semantics = [#tpu.dimension_semantics<parallel>], iteration_bounds = array<i64: 2>, scalar_prefetch = 0 : i64, scratch_operands = 0 : i64, tpu.core_type = #tpu.core_type<tc>, window_params = [{transform_indices = @transform_0, window_bounds = array<i64: 1, 32, 256>}, {pipeline_mode = #tpu.pipeline_mode<synchronous>, transform_indices = @transform_1, window_bounds = array<i64: 32, 2>}, {pipeline_mode = #tpu.pipeline_mode<synchronous>, transform_indices = @transform_2, window_bounds = array<i64: 1, 2>}, {pipeline_mode = #tpu.pipeline_mode<synchronous>, transform_indices = @transform_3, window_bounds = array<i64: 2, 32>}, {pipeline_mode = #tpu.pipeline_mode<synchronous>, transform_indices = @transform_4, window_bounds = array<i64: 1, 32>}, {pipeline_mode = #tpu.pipeline_mode<synchronous>, transform_indices = @transform_5, window_bounds = array<i64: 1, 32>}, {pipeline_mode = #tpu.pipeline_mode<synchronous>, transform_indices = @transform_6, window_bounds = array<i64: 1, 1>}, {transform_indices = @transform_7, window_bounds = array<i64: 1, 32, 256>}]} {
    %c0 = arith.constant 0 : index
    %c0_0 = arith.constant 0 : index
    %c0_1 = arith.constant 0 : index
    %0 = vector.load %arg1[%c0, %c0_0, %c0_1] : memref<1x32x256xf32, #tpu.memory_space<vmem>>, vector<1x32x256xf32>
    %cst = arith.constant dense<0.000000e+00> : vector<1x32xf32>
    %1 = vector.multi_reduction <add>, %0, %cst [2] : vector<1x32x256xf32> to vector<1x32xf32>
    %cst_2 = arith.constant 2.560000e+02 : f32
    %2 = vector.broadcast %cst_2 : f32 to vector<1x32xf32>
    %3 = arith.divf %1, %2 : vector<1x32xf32>
    %c0_3 = arith.constant 0 : index
    %c0_4 = arith.constant 0 : index
    %4 = vector.load %arg2[%c0_3, %c0_4] : memref<32x2xf32, #tpu.memory_space<vmem>>, vector<32x2xf32>
    %cst_5 = arith.constant dense<0.000000e+00> : vector<1x2xf32>
    %5 = tpu.matmul %3, %4, %cst_5 {dimension_numbers = #tpu.dot_dimension_numbers<[1], [0], [0], [1], [0, 0, 1, 1], [], []>} : vector<1x32xf32>, vector<32x2xf32>, vector<1x2xf32> -> vector<1x2xf32>
    %c0_6 = arith.constant 0 : index
    %c0_7 = arith.constant 0 : index
    %6 = vector.load %arg3[%c0_6, %c0_7] : memref<1x2xf32, #tpu.memory_space<vmem>>, vector<1x2xf32>
    %7 = arith.addf %5, %6 : vector<1x2xf32>
    %cst_8 = arith.constant 0.000000e+00 : f32
    %8 = vector.broadcast %cst_8 : f32 to vector<1x2xf32>
    %9 = arith.maximumf %7, %8 : vector<1x2xf32>
    %c0_9 = arith.constant 0 : index
    %c0_10 = arith.constant 0 : index
    %10 = vector.load %arg4[%c0_9, %c0_10] : memref<2x32xf32, #tpu.memory_space<vmem>>, vector<2x32xf32>
    %cst_11 = arith.constant dense<0.000000e+00> : vector<1x32xf32>
    %11 = tpu.matmul %9, %10, %cst_11 {dimension_numbers = #tpu.dot_dimension_numbers<[1], [0], [0], [1], [0, 0, 1, 1], [], []>} : vector<1x2xf32>, vector<2x32xf32>, vector<1x32xf32> -> vector<1x32xf32>
    %c0_12 = arith.constant 0 : index
    %c0_13 = arith.constant 0 : index
    %12 = vector.load %arg5[%c0_12, %c0_13] : memref<1x32xf32, #tpu.memory_space<vmem>>, vector<1x32xf32>
    %13 = arith.addf %11, %12 : vector<1x32xf32>
    %14 = arith.negf %13 : vector<1x32xf32>
    %15 = math.exp %14 : vector<1x32xf32>
    %cst_14 = arith.constant 1.000000e+00 : f32
    %16 = vector.broadcast %cst_14 : f32 to vector<1x32xf32>
    %17 = arith.addf %16, %15 : vector<1x32xf32>
    %18 = arith.divf %16, %17 : vector<1x32xf32>
    %19 = vector.shape_cast %18 : vector<1x32xf32> to vector<1x32x1xf32>
    %c0_15 = arith.constant 0 : index
    %c0_16 = arith.constant 0 : index
    %20 = vector.load %arg6[%c0_15, %c0_16] : memref<1x32xf32, #tpu.memory_space<vmem>>, vector<1x32xf32>
    %21 = vector.shape_cast %20 : vector<1x32xf32> to vector<1x32x1xf32>
    %22 = vector.broadcast %21 : vector<1x32x1xf32> to vector<1x32x256xf32>
    %23 = arith.mulf %0, %22 : vector<1x32x256xf32>
    %cst_17 = arith.constant dense<0.000000e+00> : vector<1x256xf32>
    %24 = vector.multi_reduction <add>, %23, %cst_17 [1] : vector<1x32x256xf32> to vector<1x256xf32>
    %c0_18 = arith.constant 0 : index
    %c0_19 = arith.constant 0 : index
    %25 = vector.load %arg7[%c0_18, %c0_19] : memref<1x1xf32, #tpu.memory_space<vmem>>, vector<1x1xf32>
    %26 = vector.extract %25[0, 0] : f32 from vector<1x1xf32>
    %27 = vector.broadcast %26 : f32 to vector<1x256xf32>
    %28 = arith.addf %24, %27 : vector<1x256xf32>
    %29 = arith.negf %28 : vector<1x256xf32>
    %30 = math.exp %29 : vector<1x256xf32>
    %cst_20 = arith.constant 1.000000e+00 : f32
    %31 = vector.broadcast %cst_20 : f32 to vector<1x256xf32>
    %32 = arith.addf %31, %30 : vector<1x256xf32>
    %33 = arith.divf %31, %32 : vector<1x256xf32>
    %34 = vector.shape_cast %33 : vector<1x256xf32> to vector<1x1x256xf32>
    %35 = vector.broadcast %19 : vector<1x32x1xf32> to vector<1x32x256xf32>
    %36 = vector.broadcast %34 : vector<1x1x256xf32> to vector<1x32x256xf32>
    %37 = arith.addf %35, %36 : vector<1x32x256xf32>
    %38 = arith.mulf %0, %37 : vector<1x32x256xf32>
    %c0_21 = arith.constant 0 : index
    %c0_22 = arith.constant 0 : index
    %c0_23 = arith.constant 0 : index
    %39 = vector.load %arg8[%c0_21, %c0_22, %c0_23] : memref<1x32x256xf32, #tpu.memory_space<vmem>>, vector<1x32x256xf32>
    tpu.vector_store %arg8[%c0_21, %c0_22, %c0_23], %38 {strides = array<i32>} : memref<1x32x256xf32, #tpu.memory_space<vmem>>, vector<1x32x256xf32>,
    return
  }
  func.func @transform_0(%arg0: i32) -> (i32, i32, i32) {
    %c0_i32 = arith.constant 0 : i32
    %c0_i32_0 = arith.constant 0 : i32
    %c0_i32_1 = arith.constant 0 : i32
    return %arg0, %c0_i32, %c0_i32_0 : i32, i32, i32
  }
  func.func @transform_1(%arg0: i32) -> (i32, i32) {
    %c0_i32 = arith.constant 0 : i32
    %c0_i32_0 = arith.constant 0 : i32
    %c0_i32_1 = arith.constant 0 : i32
    return %c0_i32, %c0_i32_0 : i32, i32
  }
  func.func @transform_2(%arg0: i32) -> (i32, i32) {
    %c0_i32 = arith.constant 0 : i32
    %c0_i32_0 = arith.constant 0 : i32
    %c0_i32_1 = arith.constant 0 : i32
    return %c0_i32, %c0_i32_0 : i32, i32
  }
  func.func @transform_3(%arg0: i32) -> (i32, i32) {
    %c0_i32 = arith.constant 0 : i32
    %c0_i32_0 = arith.constant 0 : i32
    %c0_i32_1 = arith.constant 0 : i32
    return %c0_i32, %c0_i32_0 : i32, i32
  }
  func.func @transform_4(%arg0: i32) -> (i32, i32) {
    %c0_i32 = arith.constant 0 : i32
    %c0_i32_0 = arith.constant 0 : i32
    %c0_i32_1 = arith.constant 0 : i32
    return %c0_i32, %c0_i32_0 : i32, i32
  }
  func.func @transform_5(%arg0: i32) -> (i32, i32) {
    %c0_i32 = arith.constant 0 : i32
    %c0_i32_0 = arith.constant 0 : i32
    %c0_i32_1 = arith.constant 0 : i32
    return %c0_i32, %c0_i32_0 : i32, i32
  }
  func.func @transform_6(%arg0: i32) -> (i32, i32) {
    %c0_i32 = arith.constant 0 : i32
    %c0_i32_0 = arith.constant 0 : i32
    %c0_i32_1 = arith.constant 0 : i32
    return %c0_i32, %c0_i32_0 : i32, i32
  }
  func.func @transform_7(%arg0: i32) -> (i32, i32, i32) {
    %c0_i32 = arith.constant 0 : i32
    %c0_i32_0 = arith.constant 0 : i32
    %c0_i32_1 = arith.constant 0 : i32
    return %arg0, %c0_i32, %c0_i32_0 : i32, i32, i32
  }
}

</mosaic_0001>

<bundles_post_ra>
// kernel: tpu_custom_call.1
= control target key start
LH: loop header
LB: loop body
LE: loop exit
PB: predicated region body
PF: predicated region fallthrough
CT: control target
= control target key end

     0   :  { %s1111_s0 = inlined_call_operand.hbm [shape: f32[2,32,256], index: 0, kind: input, shape index: {}]   ;;  %s1112_s1 = inlined_call_operand.vmem [shape: f32[32,2], index: 1, kind: input, shape index: {}]   ;;  %s1113_s2 = inlined_call_operand.vmem [shape: f32[1,2], index: 2, kind: input, shape index: {}]   ;;  %s1114_s3 = inlined_call_operand.vmem [shape: f32[2,32], index: 3, kind: input, shape index: {}]   ;;  %s1115_s4 = inlined_call_operand.vmem [shape: f32[1,32], index: 4, kind: input, shape index: {}]   ;;  %s1116_s5 = inlined_call_operand.vmem [shape: f32[1,32], index: 5, kind: input, shape index: {}]   ;;  %s1117_s6 = inlined_call_operand.<no memory space> [shape: f32[1,1], index: 6, kind: input, shape index: {}]   ;;  %s1118_s7 = inlined_call_operand.hbm [shape: f32[2,32,256], index: 7, kind: output, shape index: {}]  }
   0x1   :  { %v12_v0 = vstv %s1117_s6 }
   0x2   :  { %13 = vst [vmem:[#allocation2] sm:$0x1] %v12_v0 }
   0x3   :  { %14 = vsyncpa [#allocation4], 0 }
   0x4   :  { %16 = vsyncpa [#allocation4 + $0x1], 0 }
   0x5   :  { %17 = vsyncpa [#allocation5], 0 }
   0x6   :  { %19 = vsyncpa [#allocation5 + $0x1], 0  ;;  %s907_s26 = smov 0   ;;  %s909_s27 = smov 0  }
   0x7   :  { %s911_s28 = smov 0   ;;  %s913_s29 = smov 0  }
   0x8 LB: > { %s928_s6 = sadd.s32 4294967295, %s857_s29   ;;  %s662_s30 = sadd.s32 4294967294, %s857_s29   ;;  %s857_s29 = sphi %s913_s29, %s1128_s29   ;;  %s853_s28 = sphi %s911_s28, %s1127_s28   ;;  %s849_s27 = sphi %s909_s27, %s1126_s27   ;;  %s845_s26 = sphi %s907_s26, %s1125_s26  }
   0x9   : > { %s932_s8 = sadd.s32 1, %s857_s29   ;;  %s32_s9 = sadd.s32 1, %s853_s28 }
   0xa   : > { %s29_s10 = ssub.s32 %s857_s29, %s932_s8  ;;  %p39_p0 = scmp.ne.s32.totalorder %s853_s28, %s849_s27 }
   0xb   : > { %p30_p1 = scmp.eq.s32.totalorder %s29_s10, 0  ;;  %p40_p2 = scmp.eq.s32.totalorder %s857_s29, 0 }
   0xc   : > { %p45_p3 = scmp.ne.s32.totalorder %s849_s27, %s845_s26  ;;  %p46_p4 = scmp.eq.s32.totalorder %s928_s6, 0 }
   0xd   : > { %s944_s11 = scalar_select %p30_p1, %s853_s28, %s32_s9  }
   0xe   : > { %p946_p5 = por %p40_p2, %p39_p0  ;;  %p950_p6 = por %p46_p4, %p45_p3 }
   0xf   : > { %p195_p7 = scmp.eq.s32.totalorder %s928_s6, 1  ;;  %p201_p8 = scmp.eq.s32.totalorder %s662_s30, 1 }
  0x10   : > { %p698_p10 = scmp.lt.s32.totalorder %s857_s29, 2  ;;  %s239_s16 = sand.u32 1, %s853_s28  }
  0x11   : > { %p957_p11 = por %p195_p7, %p39_p0  ;;  %p961_p12 = por %p201_p8, %p45_p3 }
  0x12   : > { %s682_s17 = sshll.u32 %s857_s29, 6  ;;  %s665_s18 = sshll.u32 %s239_s16, 6 }
  0x13   : > { %s248_s21 = scalar_lea.hbm %s1111_s0, %s682_s17  ;;  %s243_s23 = scalar_lea.vmem [#allocation3], %s665_s18 }
  0x14   : > { %s249_s22 = sshll.u32 %s248_s21, 4  ;;  %s251_s24 = sshll.u32 %s243_s23, 4  ;;  %s250_s22 = int_to_ptr.hbm [resolvable:$true] %s249_s22  ;;  %s252_s24 = int_to_ptr.vmem [resolvable:$true] %s251_s24 }
  0x15   : > { %p972_p13 = pnand %p698_p10, %p946_p5  ;;  %p668_p0 = scmp.ge.s32.totalorder %s857_s29, 1 }
  0x16   : > { %p259_p1 = scmp.lt.s32.totalorder %s857_s29, 3  ;;  %s240_s30 = scalar_lea.sflag [#allocation4], %s239_s16 }
  0x17   : > { %s761_s9 = sshra.s32 %s250_s22, 4  ;;  %p765_p3 = pneg %p972_p13  ;;  %s762_s9 = int_to_ptr.hbm [resolvable:$true] %s761_s9 }
  0x18   : > { %s763_s10 = scalar_lea.hbm %s762_s9, 64  ;;  %s768_s12 = scalar_lea.hbm %s1111_s0, 128 }
  0x19   : > { %p764_p2 = scmp.ne.s32.totalorder %s762_s9, %s763_s10  ;;  %p769_p5 = scmp.lt.s32.totalorder %s762_s9, %s1111_s0 }
  0x1a   : > { %p770_p8 = scmp.lt.s32.totalorder %s768_s12, %s763_s10 }
  0x1b   : > { %p766_p4 = pnand %p765_p3, %p764_p2 }
  0x1c   : > { %p771_p10 = por %p770_p8, %p769_p5 }
  0x1d   : > { %p767_p7 = pneg %p766_p4 }
  0x1f   : > { %p772_p9 = pnand %p771_p10, %p767_p7 }
  0x21   : > { %775 = shalt.err (!%p772_p9)
}
  0x22   : > { %s859_s16 = smov 256   ;;  %s860_s21 = smov 16  }
  0x23   : > { %693 = dma.hbm_to_vmem [thread:$0]  (!%p972_p13), %s250_s22, 1024, %s252_s24, %s240_s30, %s859_s16, %s859_s16, %s860_s21  }
  0x24   : > { %p260_p2 = pnand %p668_p0, %p259_p1 }
  0x25   : > { %s993_s23 = sand.u32 (!%p260_p2), 1, %s849_s27  }
  0x26   : > { %263 = sbr.rel (%p260_p2) target bundleno = 614 (0x266), region = 48  ;;  %s669_s9 = sshll.u32 (!%p260_p2), %s993_s23, 6 }
  0x27   : > { %s266_s10 = scalar_lea.sflag (!%p260_p2), [#allocation4], %s993_s23  ;;  %s269_s17 = scalar_lea.vmem (!%p260_p2), [#allocation3], %s669_s9 }
  0x2b   : > { %836 = dma.done.wait (%p950_p6), %s266_s10, 1024  }
  0x2c   : > { %838 = vsyncadd (%p950_p6), %s266_s10, 4294966272  ;;  %v1003_v1 = vld [vmem:[%s269_s17] sm:$0xff]  ;;  %v1005_v2 = vld [vmem:[%s269_s17 + $0x8] sm:$0xff]  ;;  %v861_v15 = vmov 256.0   ;;  %v341_v23 = vlaneseq  ;;  %vm346_vm1 = vcmask 130112   ;;  %vm350_vm2 = vcmask 195712  }
  0x2d   : > { %v1007_v3 = vld [vmem:[%s269_s17 + $0x20] sm:$0xff]  ;;  %v309_v4 = vadd.f32 %v1005_v2, %v1003_v1  ;;  %v1011_v5 = vld [vmem:[%s269_s17 + $0x28] sm:$0xff]  ;;  %v1015_v7 = vld [vmem:[%s269_s17 + $0x10] sm:$0xff]  ;;  %747 = vrcp.f32 %v861_v15  ;;  %vm354_vm3 = vcmask 261312   ;;  %vm356_vm4 = vcmask 261120   ;;  %s300_s30 = scalar_lea.vmem [#allocation6], %s669_s9 }
  0x2e   : > { %v315_v6 = vadd.f32 %v1011_v5, %v1007_v3  ;;  %v1017_v8 = vld [vmem:[%s269_s17 + $0x18] sm:$0xff]  ;;  %v1019_v9 = vld [vmem:[%s269_s17 + $0x30] sm:$0xff]  ;;  %v333_v16 = vld [vmem:[%s1112_s1 + $0x8] sm:$0xff]  ;;  %v342_v27 = vand.u32 127, %v341_v23  ;;  %vm386_vm5 = vcmask 1041408   ;;  %v431_v45 = vshrl.u32 %v341_v23, 7 }
  0x2f   : > { %310 = vadd.xlane.f32.xlu0 %v309_v4  ;;  %v1021_v10 = vld [vmem:[%s269_s17 + $0x38] sm:$0xff]  ;;  %v312_v11 = vadd.f32 %v1017_v8, %v1015_v7  ;;  %v334_v14 = vld [vmem:[%s1112_s1 + $0x10] sm:$0xff]  ;;  %vm382_vm6 = vcmask 15360   ;;  %s683_s9 = sshll.u32 %s928_s6, 6  ;;  %s586_s20 = sshll.u32 %s300_s30, 4  ;;  %s587_s20 = int_to_ptr.vmem [resolvable:$true] %s586_s20 }
  0x30   : > { %316 = vadd.xlane.f32.xlu1 %v315_v6  ;;  %v318_v12 = vadd.f32 %v1021_v10, %v1019_v9  ;;  %v335_v13 = vld [vmem:[%s1112_s1 + $0x18] sm:$0xff]  ;;  %v332_v17 = vld [vmem:[%s1112_s1] sm:$0xff]  ;;  %v344_v29 = vadd.s32 4294967288, %v342_v27  ;;  %v348_v30 = vadd.s32 4294967280, %v342_v27  ;;  %v352_v33 = vadd.s32 4294967272, %v342_v27  ;;  %737 = vset.pattern.permute.xlu2 %v431_v45  ;;  %s585_s19 = scalar_lea.hbm %s1118_s7, %s683_s9  ;;  %s574_s21 = scalar_lea.sflag [#allocation5], %s993_s23 }
  0x31   : > { %371 = vmatpush.msra.mxu0 %v335_v13  ;;  %v380_v44 = vld [vmem:[%s1114_s3] sm:$0x3]  ;;  %v1042_v46 = vadd.s32 16, %v431_v45  ;;  %v1044_v47 = vadd.s32 24, %v431_v45  ;;  %v438_v49 = vadd.s32 8, %v431_v45  ;;  %s588_s16 = sshll.u32 %s585_s19, 4  ;;  %s589_s16 = int_to_ptr.hbm [resolvable:$true] %s588_s16 }
  0x32   : > { %672 = vmatpush.msk.msra.mxu1 %vm386_vm5, %v380_v44  ;;  %v746_v48 = vld [vmem:[%s1116_s5] ss:$0 sm:$0xff]  ;;  %s805_s6 = sshra.s32 %s589_s16, 4  ;;  %s811_s22 = scalar_lea.hbm %s1118_s7, 128  ;;  %s806_s6 = int_to_ptr.hbm [resolvable:$true] %s805_s6 }
  0x33   : > { %372 = vmatpush.msra.mxu0 %v334_v14  ;;  %v748_v18 = vpop.eup %747  ;;  %739 = vset.pattern.permute.xlu0 %v1042_v46  ;;  %v336_v50 = vld [vmem:[%s1113_s2] sm:$0x1]  ;;  %s807_s10 = scalar_lea.hbm %s806_s6, 64  ;;  %p812_p0 = scmp.lt.s32.totalorder %s806_s6, %s1118_s7 }
  0x34   : > { %v322_v19 = vmul.f32 256.0, %v748_v18  ;;  %vm326_vm0 = vweird.f32 %v748_v18  ;;  %740 = vset.pattern.permute.xlu1 %v1044_v47  ;;  %v381_v54 = vld [vmem:[%s1115_s4] sm:$0x1]  ;;  %p808_p6 = scmp.ne.s32.totalorder %s806_s6, %s807_s10  ;;  %p813_p1 = scmp.lt.s32.totalorder %s811_s22, %s807_s10 }
  0x35   : > { %373 = vmatpush.msra.mxu0 %v333_v16  ;;  %v506_v58 = vld [vmem:[#allocation2] sm:$0x1] }
  0x36   : > { %v323_v20 = vsub.f32 1.0, %v322_v19  ;;  %684 = vpush %v506_v58  ;;  %p809_p9 = pnand %p808_p6, %p957_p11  ;;  %p814_p3 = por %p813_p1, %p812_p0 }
  0x37   : > { %313 = vadd.xlane.f32.xlu0 %v312_v11  ;;  %374 = vmatpush.msra.mxu0 %v332_v17 }
  0x38   : > { %319 = vadd.xlane.f32.xlu1 %v318_v12  ;;  %v324_v21 = vmul.f32 %v748_v18, %v323_v20  ;;  %460 = vperm.xlu2 %737, %v746_v48   ;;  %p810_p13 = pneg %p809_p9 }
  0x3a   : > { %v325_v22 = vadd.f32 %v748_v18, %v324_v21  ;;  %p815_p4 = pnand %p814_p3, %p810_p13 }
  0x3c   : > { %v327_v26 = vsel %vm326_vm0, %v748_v18, %v325_v22 }
  0x40   : > { %738 = vset.pattern.permute.xlu2 %v438_v49 }
  0x48   : > { %466 = vperm.xlu2 %738, %v746_v48  }
  0x4b   : > { %472 = vperm.xlu0 %739, %v746_v48  }
  0x50   : > { %741 = vset.pattern.permute.xlu2 %v431_v45 }
  0x51   : > { %478 = vperm.xlu1 %740, %v746_v48  }
  0x53   : > { %745 = vset.pattern.permute.xlu0 %v1044_v47 }
  0x67   : > { %s685_s25 = spop %684 }
  0x68   : > { %v508_v48 = vstv %s685_s25 }
  0x92   : > { %v461_v11 = vpop.permute.xlu2 %460 }
  0x93   : > { %v480_v18 = vmul.f32 %v461_v11, %v1003_v1  ;;  %v481_v19 = vmul.f32 %v461_v11, %v1005_v2 }
  0xa2   : > { %v311_v24 = vpop.xlane.xlu0 %310  ;;  %v467_v17 = vpop.permute.xlu2 %466 }
  0xa3   : > { %v317_v25 = vpop.xlane.xlu1 %316  ;;  %v328_v28 = vmul.f32 %v327_v26, %v311_v24  ;;  %v482_v20 = vmul.f32 %v467_v17, %v1015_v7  ;;  %v483_v21 = vmul.f32 %v467_v17, %v1017_v8 }
  0xa4   : > { %v330_v31 = vmul.f32 %v327_v26, %v317_v25 }
  0xa5   : > { %v343_v37 = vperm.slane %v328_v28, %v342_v27  ;;  %v488_v22 = vadd.f32 %v482_v20, %v480_v18  ;;  %v497_v23 = vadd.f32 %v483_v21, %v481_v19 }
  0xa6   : > { %v349_v39 = vperm.slane %v330_v31, %v348_v30 }
  0xaa   : > { %v314_v32 = vpop.xlane.xlu0 %313 }
  0xab   : > { %v329_v34 = vmul.f32 %v327_v26, %v314_v32  ;;  %v320_v35 = vpop.xlane.xlu1 %319 }
  0xac   : > { %v331_v36 = vmul.f32 %v327_v26, %v320_v35 }
  0xad   : > { %v345_v38 = vperm.slane %v329_v34, %v344_v29 }
  0xae   : > { %v353_v40 = vperm.slane %v331_v36, %v352_v33 }
  0xaf   : > { %v347_v41 = vsel %vm346_vm1, %v345_v38, %v343_v37 }
  0xb0   : > { %v351_v42 = vsel %vm350_vm2, %v349_v39, %v347_v41 }
  0xb1   : > { %v355_v43 = vsel %vm354_vm3, %v353_v40, %v351_v42 }
  0xb2   : > { %671 = vmatmul.msk.f32.vlgmr.msra.gmra.mxu0 %vm356_vm4, %v355_v43 }
  0xbd   : > { %v473_v24 = vpop.permute.xlu0 %472 }
  0xbe   : > { %v484_v26 = vmul.f32 %v473_v24, %v1007_v3  ;;  %v485_v27 = vmul.f32 %v473_v24, %v1011_v5 }
  0xc0   : > { %v489_v30 = vadd.f32 %v488_v22, %v484_v26  ;;  %v498_v31 = vadd.f32 %v497_v23, %v485_v27 }
  0xc3   : > { %v479_v25 = vpop.permute.xlu1 %478 }
  0xc4   : > { %v486_v28 = vmul.f32 %v479_v25, %v1019_v9  ;;  %v487_v29 = vmul.f32 %v479_v25, %v1021_v10 }
  0xc6   : > { %v490_v32 = vadd.f32 %v489_v30, %v486_v28  ;;  %v499_v33 = vadd.f32 %v498_v31, %v487_v29 }
  0xc8   : > { %v491_v34 = vrot.slane %v490_v32, 4  ;;  %v500_v35 = vrot.slane %v499_v33, 4 }
  0xca   : > { %v492_v36 = vadd.f32 %v491_v34, %v490_v32  ;;  %v501_v37 = vadd.f32 %v500_v35, %v499_v33 }
  0xcc   : > { %v493_v38 = vrot.slane %v492_v36, 2  ;;  %v502_v39 = vrot.slane %v501_v37, 2 }
  0xce   : > { %v494_v40 = vadd.f32 %v493_v38, %v492_v36  ;;  %v503_v41 = vadd.f32 %v502_v39, %v501_v37 }
  0xd0   : > { %v495_v42 = vrot.slane %v494_v40, 1  ;;  %v504_v43 = vrot.slane %v503_v41, 1 }
  0xd2   : > { %v496_v44 = vadd.f32 %v495_v42, %v494_v40  ;;  %v505_v45 = vadd.f32 %v504_v43, %v503_v41 }
 0x12f   : > { %v376_v51 = vpop.f32.mrf.mxu0 }
 0x130   : > { %v377_v52 = vadd.f32 %v376_v51, %v336_v50  ;;  %v510_v50 = vadd.f32 %v508_v48, %v505_v45 }
 0x132   : > { %v379_v53 = vmax.f32 %v377_v52, 0.0  ;;  %v676_v52 = vmul.f32 -1.442695, %v510_v50 }
 0x134   : > { %673 = vmatmul.msk.f32.vlgmr.msra.gmra.mxu1 %vm382_vm6, %v379_v53 }
 0x1b1   : > { %v407_v55 = vpop.f32.mrf.mxu1 }
 0x1b2   : > { %v408_v56 = vadd.f32 %v407_v55, %v381_v54 }
 0x1b4   : > { %v674_v57 = vmul.f32 -1.442695, %v408_v56 }
 0x1b6   : > { %749 = vpow2.f32 %v674_v57 }
 0x1bc   : > { %v750_v59 = vpop.eup %749 }
 0x1bd   : > { %v413_v60 = vadd.f32 1.0, %v750_v59 }
 0x1bf   : > { %751 = vrcp.f32 %v413_v60  ;;  %v425_v0 = vand.u32 2147483648, %v413_v60  ;;  %v423_v6 = vand.u32 2147483647, %v413_v60  ;;  %vm419_vm8 = vweird.f32 %v413_v60 }
 0x1c1   : > { %v426_v13 = vor.u32 1.1754944e-38, %v425_v0  ;;  %vm424_vm10 = vcmp.eq.f32.partialorder %v423_v6, 8.507059e+37 }
 0x1c5   : > { %v752_v61 = vpop.eup %751 }
 0x1c6   : > { %v415_v62 = vmul.f32 %v752_v61, %v413_v60  ;;  %vm420_vm7 = vweird.f32 %v752_v61 }
 0x1c7   : > { %vm421_vm9 = vmor %vm419_vm8, %vm420_vm7 }
 0x1c8   : > { %v416_v63 = vsub.f32 1.0, %v415_v62 }
 0x1ca   : > { %v417_v4 = vmul.f32 %v752_v61, %v416_v63 }
 0x1cc   : > { %v418_v12 = vadd.f32 %v752_v61, %v417_v4 }
 0x1ce   : > { %v422_v14 = vsel %vm421_vm9, %v752_v61, %v418_v12 }
 0x1cf   : > { %v427_v15 = vsel %vm424_vm10, %v426_v13, %v422_v14 }
 0x1d0   : > { %v429_v16 = vperm.slane %v427_v15, 0 }
 0x1d2   : > { %434 = vperm.xlu2 %741, %v429_v16  }
 0x1da   : > { %742 = vset.pattern.permute.xlu2 %v438_v49  ;;  %v509_v49 = vadd.f32 %v508_v48, %v496_v44 }
 0x1dc   : > { %v675_v51 = vmul.f32 -1.442695, %v509_v49 }
 0x1de   : > { %753 = vpow2.f32 %v675_v51 }
 0x1df   : > { %755 = vpow2.f32 %v676_v52 }
 0x1e2   : > { %440 = vperm.xlu2 %742, %v429_v16  }
 0x1e4   : > { %v754_v53 = vpop.eup %753 }
 0x1e5   : > { %v517_v54 = vadd.f32 1.0, %v754_v53 }
 0x1e7   : > { %757 = vrcp.f32 %v517_v54  ;;  %vm524_vm11 = vweird.f32 %v517_v54  ;;  %v528_v6 = vand.u32 2147483647, %v517_v54 }
 0x1e9   : > { %vm529_vm1 = vcmp.eq.f32.partialorder %v528_v6, 8.507059e+37 }
 0x1ea   : > { %743 = vset.pattern.permute.xlu2 %v1042_v46  ;;  %v756_v46 = vpop.eup %755 }
 0x1eb   : > { %v518_v55 = vadd.f32 1.0, %v756_v46 }
 0x1ed   : > { %759 = vrcp.f32 %v518_v55  ;;  %v758_v56 = vpop.eup %757  ;;  %vm539_vm13 = vweird.f32 %v518_v55  ;;  %v545_v0 = vand.u32 2147483648, %v518_v55  ;;  %v543_v12 = vand.u32 2147483647, %v518_v55 }
 0x1ee   : > { %v520_v58 = vmul.f32 %v758_v56, %v517_v54  ;;  %vm525_vm12 = vweird.f32 %v758_v56 }
 0x1ef   : > { %vm526_vm15 = vmor %vm524_vm11, %vm525_vm12  ;;  %v546_v14 = vor.u32 1.1754944e-38, %v545_v0  ;;  %vm544_vm2 = vcmp.eq.f32.partialorder %v543_v12, 8.507059e+37 }
 0x1f0   : > { %v521_v60 = vsub.f32 1.0, %v520_v58 }
 0x1f2   : > { %446 = vperm.xlu2 %743, %v429_v16   ;;  %v522_v62 = vmul.f32 %v758_v56, %v521_v60 }
 0x1f3   : > { %v760_v57 = vpop.eup %759 }
 0x1f4   : > { %v535_v59 = vmul.f32 %v760_v57, %v518_v55  ;;  %vm540_vm14 = vweird.f32 %v760_v57  ;;  %v523_v4 = vadd.f32 %v758_v56, %v522_v62 }
 0x1f5   : > { %vm541_vm0 = vmor %vm539_vm13, %vm540_vm14 }
 0x1f6   : > { %v536_v61 = vsub.f32 1.0, %v535_v59  ;;  %v527_v15 = vsel %vm526_vm15, %v758_v56, %v523_v4 }
 0x1f8   : > { %v537_v63 = vmul.f32 %v760_v57, %v536_v61 }
 0x1fa   : > { %744 = vset.pattern.permute.xlu2 %v1044_v47  ;;  %v530_v47 = vand.u32 2147483648, %v517_v54  ;;  %v538_v11 = vadd.f32 %v760_v57, %v537_v63 }
 0x1fc   : > { %v531_v13 = vor.u32 1.1754944e-38, %v530_v47 }
 0x1fe   : > { %v532_v17 = vsel %vm529_vm1, %v531_v13, %v527_v15 }
 0x202   : > { %452 = vperm.xlu2 %744, %v429_v16   ;;  %v542_v16 = vsel %vm541_vm0, %v760_v57, %v538_v11 }
 0x203   : > { %v547_v18 = vsel %vm544_vm2, %v546_v14, %v542_v16 }
 0x22c   : > { %v435_v19 = vpop.permute.xlu2 %434 }
 0x22d   : > { %v549_v20 = vadd.f32 %v532_v17, %v435_v19  ;;  %v550_v21 = vadd.f32 %v547_v18, %v435_v19 }
 0x22f   : > { %v557_v22 = vmul.f32 %v549_v20, %v1003_v1  ;;  %v558_v23 = vmul.f32 %v550_v21, %v1005_v2 }
 0x231   : > { %565 = vst [vmem:[%s300_s30] sm:$0xff] %v557_v22 }
 0x232   : > { %566 = vst [vmem:[%s300_s30 + $0x8] sm:$0xff] %v558_v23 }
 0x23c   : > { %v441_v24 = vpop.permute.xlu2 %440 }
 0x23d   : > { %v551_v25 = vadd.f32 %v532_v17, %v441_v24  ;;  %v552_v26 = vadd.f32 %v547_v18, %v441_v24 }
 0x23f   : > { %v559_v27 = vmul.f32 %v551_v25, %v1015_v7  ;;  %v560_v28 = vmul.f32 %v552_v26, %v1017_v8 }
 0x241   : > { %567 = vst [vmem:[%s300_s30 + $0x10] sm:$0xff] %v559_v27 }
 0x242   : > { %568 = vst [vmem:[%s300_s30 + $0x18] sm:$0xff] %v560_v28 }
 0x24c   : > { %v447_v29 = vpop.permute.xlu2 %446 }
 0x24d   : > { %v553_v30 = vadd.f32 %v532_v17, %v447_v29  ;;  %v554_v31 = vadd.f32 %v547_v18, %v447_v29 }
 0x24f   : > { %v561_v1 = vmul.f32 %v553_v30, %v1007_v3  ;;  %v562_v2 = vmul.f32 %v554_v31, %v1011_v5 }
 0x251   : > { %569 = vst [vmem:[%s300_s30 + $0x20] sm:$0xff] %v561_v1 }
 0x252   : > { %570 = vst [vmem:[%s300_s30 + $0x28] sm:$0xff] %v562_v2 }
 0x25c   : > { %v453_v7 = vpop.permute.xlu2 %452 }
 0x25d   : > { %v555_v8 = vadd.f32 %v532_v17, %v453_v7  ;;  %v556_v32 = vadd.f32 %v547_v18, %v453_v7 }
 0x25f   : > { %v563_v33 = vmul.f32 %v555_v8, %v1019_v9  ;;  %v564_v3 = vmul.f32 %v556_v32, %v1021_v10 }
 0x261   : > { %571 = vst [vmem:[%s300_s30 + $0x30] sm:$0xff] %v563_v33 }
 0x262   : > { %572 = vst [vmem:[%s300_s30 + $0x38] sm:$0xff] %v564_v3 }
 0x263   : > { %818 = shalt.err (!%p815_p4)
}
 0x264   : > { %s862_s23 = smov 256   ;;  %s863_s30 = smov 16  }
 0x265   : > { %688 = dma.vmem_to_hbm [thread:$0]  (%p957_p11), %s587_s20, 1024, %s589_s16, %s574_s21, %s862_s23, %s862_s23, %s863_s30  }
 0x266 PF: > { %s603_s9 = sand.u32 1, %s845_s26   ;;  %p1124_p7 = scmp.ge.s32.totalorder %s857_s29, 2 }
 0x267   : > { %s604_s18 = scalar_lea.sflag [#allocation5], %s603_s9 }
 0x268   : > { %p695_p5 = pnand %p1124_p7, %p961_p12 }
 0x26a   : > { %p696_p8 = pneg %p695_p5 }
 0x26c   : > { %840 = dma.done.wait (%p696_p8), %s604_s18, 1024  }
 0x26d   : > { %842 = vsyncadd (%p696_p8), %s604_s18, 4294966272  ;;  %p22_p10 = scmp.ge.s32.totalorder %s932_s8, 4   ;;  %s1125_s26 = smov %s849_s27 }
 0x26e   : > { %s1126_s27 = smov %s853_s28  ;;  %s1127_s28 = smov %s944_s11 }
 0x26f   : > { %s1128_s29 = smov %s932_s8  ;;  %24 = sbr.rel (!%p22_p10) target bundleno = 8 (0x8), region = 93 }
 0x274   :  { %610 = vsyncpa [#allocation4], 1 }
 0x275   :  { %612 = vsyncpa [#allocation4 + $0x1], 1 }
 0x276   :  { %613 = vsyncpa [#allocation5], 1 }
 0x277   :  { %615 = vsyncpa [#allocation5 + $0x1], 1 }

</bundles_post_ra>
